<compile_context>
chip_gen: v7x
topology: tpu7x:2x2x1
jax: 0.10.0
libtpu: 0.0.40
codegen_flags: <defaults>
</compile_context>

<pallas_src>
import jax
import jax.numpy as jnp
from jax.experimental import pallas as pl
from jax.experimental.pallas import tpu as pltpu

_MIB = 1024 * 1024


# ----------------------------------------------------------------------------
# Generation query helpers.
# ----------------------------------------------------------------------------
def _tpu_params():
    """Returns (physical VMEM bytes, memory/compute ridge in flop/byte)."""
    vmem_cap = 64 * _MIB                       # conservative default (v7x size)
    try:
        vmem_cap = int(pltpu.get_tpu_info().vmem_capacity_bytes)
    except Exception:
        pass
    ridge = 600.0                              # v6e / v7x class
    try:
        kind = jax.devices()[0].device_kind.lower()
        if any(t in kind for t in ("v2", "v3", "v4", "v5")):
            ridge = 200.0                      # v5e class: stay narrow
    except Exception:
        pass
    return vmem_cap, ridge


def _choose_groups_per_block(num_groups, cpg, num_channels, target_lanes):
    """Largest group batch whose lane width is legal (multiple of 128, or the
    full channel dim) and <= target_lanes; otherwise the smallest legal one.
    num_groups itself is always legal (cols == num_channels)."""
    legal = [g for g in range(1, num_groups + 1)
             if num_groups % g == 0
             and (((g * cpg) % 128 == 0) or (g * cpg == num_channels))]
    within = [g for g in legal if g * cpg <= target_lanes]
    return max(within) if within else min(legal)


# ----------------------------------------------------------------------------
# Kernel factory.
# ----------------------------------------------------------------------------
def _make_moment_kernel(num_frames: int, tiles_per_split: int, needs_mask: bool):
    """grid = (group_blocks ['parallel'], frame_splits ['parallel'],
               frame_tiles ['arbitrary']).

    Accumulates X^T X and the column sums of the current (tile_f, cols) block
    into the output refs (resident across the innermost axis)."""

    def kernel(x_ref, xtx_ref, colsum_ref):
        f = pl.program_id(2)

        @pl.when(f == 0)
        def _init():
            xtx_ref[...] = jnp.zeros_like(xtx_ref)
            colsum_ref[...] = jnp.zeros_like(colsum_ref)

        x = x_ref[...]                               # (tile_f, cols), native dtype
        tile_f, cols = x_ref.shape

        if needs_mask:
            # Zero the out-of-range tail rows in-kernel (the last block is
            # partially out of bounds; no wrapper-side pad pass over HBM).
            row0 = (pl.program_id(1) * tiles_per_split + f) * tile_f
            rows = jax.lax.broadcasted_iota(jnp.int32, (tile_f, cols), 0)
            x = jnp.where(rows < (num_frames - row0), x, jnp.zeros_like(x))

        # X^T X on the MXU: contract the frames axis directly (no transpose).
        xtx_ref[...] += jax.lax.dot_general(
            x, x, dimension_numbers=(((0,), (0,)), ((), ())),
            preferred_element_type=jnp.float32)[None]

        # Column sums also on the MXU (ones-row contraction): avoids a
        # full-tile f32 cast and a per-tile sublane reduction on the VPU.
        ones_row = jnp.ones((1, tile_f), dtype=x.dtype)
        colsum_ref[...] += jax.lax.dot_general(
            ones_row, x, dimension_numbers=(((1,), (0,)), ((), ())),
            preferred_element_type=jnp.float32)[None]

    return kernel


# ----------------------------------------------------------------------------
# Wrapper: _whitening_metric(x, num_groups) via Pallas.
# ----------------------------------------------------------------------------
def whitening_metric(x, num_groups: int, max_frame_tile=None):
    assert x.dtype != jnp.float16
    assert num_groups >= 1
    num_channels = x.shape[-1]
    assert num_channels % num_groups == 0
    cpg = num_channels // num_groups

    x2 = x.reshape(-1, num_channels)          # native dtype (bf16 stays bf16)
    num_frames = x2.shape[0]
    itemsize = jnp.dtype(x2.dtype).itemsize

    vmem_cap, ridge = _tpu_params()
    big_vmem = vmem_cap >= 100 * _MIB         # 128 MiB (v5e/v6e) vs 64 MiB (v7x)

    # ---- lane width: batch groups per block while staying memory-bound -----
    target_lanes = max(128, min(512, int(ridge * itemsize / 2) // 128 * 128))
    gpb = _choose_groups_per_block(num_groups, cpg, num_channels, target_lanes)
    cols = gpb * cpg
    num_group_blocks = num_groups // gpb

    # ---- frame tile: biggest block inside the per-generation VMEM budget ---
    # TODO(synk): a single group with a very large channel dim (cols^2 f32
    # accumulator approaching VMEM) would need a column-tiled covariance; not
    # needed for zipformer's channel sizes.
    acc_bytes = 2 * (cols * cols + cols) * 4              # double-buffered moments
    ws_budget = (40 if big_vmem else 24) * _MIB           # input working set
    per_block_cap = (8 if big_vmem else 4) * _MIB         # HBM-roofline sweet spot
    in_cap = max(512 * 1024, min(per_block_cap, (ws_budget - acc_bytes) // 2))
    row_align = 8 * max(1, 4 // itemsize)                 # full sublane packing
    tile_cap = max(row_align,
                   (in_cap // max(cols * itemsize, 1)) // row_align * row_align)
    if max_frame_tile is not None:
        tile_cap = min(tile_cap,
                       max(row_align, max_frame_tile // row_align * row_align))
    frames_aligned = -(-num_frames // row_align) * row_align
    tile_f = int(min(tile_cap, frames_aligned))
    n_frame_tiles = -(-num_frames // tile_f)
    needs_mask = (num_frames % tile_f) != 0

    # ---- split the frame axis so one group block still fills 2 TCs (v7x) ---
    nsplit = 2 if (num_group_blocks == 1 and n_frame_tiles >= 4
                   and n_frame_tiles % 2 == 0) else 1
    tiles_per_split = n_frame_tiles // nsplit

    kernel = _make_moment_kernel(num_frames, tiles_per_split, needs_mask)

    in_block_bytes = tile_f * cols * itemsize
    needed = 2 * in_block_bytes + acc_bytes + 2 * _MIB
    vmem_limit = int(min(vmem_cap - 16 * _MIB,
                         max(32 * _MIB, needed + 16 * _MIB)))

    n_parts = num_group_blocks * nsplit
    xtx_parts, colsum_parts = pl.pallas_call(
        kernel,
        grid=(num_group_blocks, nsplit, tiles_per_split),
        in_specs=[pl.BlockSpec(
            (tile_f, cols),
            lambda g, s, f: (s * tiles_per_split + f, g))],
        out_specs=[
            pl.BlockSpec((1, cols, cols),
                         lambda g, s, f: (g * nsplit + s, 0, 0)),
            pl.BlockSpec((1, 1, cols),
                         lambda g, s, f: (g * nsplit + s, 0, 0)),
        ],
        out_shape=[
            jax.ShapeDtypeStruct((n_parts, cols, cols), jnp.float32),
            jax.ShapeDtypeStruct((n_parts, 1, cols), jnp.float32),
        ],
        compiler_params=pltpu.CompilerParams(
            dimension_semantics=("parallel", "parallel", "arbitrary"),
            vmem_limit_bytes=vmem_limit),
        cost_estimate=pl.CostEstimate(
            flops=int(2 * num_frames * num_channels * (cols + 1)),
            transcendentals=0,
            bytes_accessed=int(num_frames * num_channels * itemsize
                               + n_parts * (cols * cols + cols) * 4)),
    )(x2)

    # ---- tiny O(C^2) epilogue in plain JAX: center + masked reductions -----
    # TODO(synk): moment-form covariance (X^T X - N mu mu^T) loses precision
    # vs the reference's pre-centered matmul when per-channel means dominate
    # the std; a two-pass (mean-first) variant would cost a second HBM read.
    n = jnp.float32(num_frames)
    xtx = xtx_parts.reshape(num_group_blocks, nsplit, cols, cols).sum(axis=1)
    colsum = colsum_parts.reshape(num_group_blocks, nsplit, 1, cols).sum(axis=1)
    mu = colsum / n                                            # (Gb, 1, cols)
    covar = xtx - n * (jnp.swapaxes(mu, -1, -2) * mu)          # (Gb, cols, cols)

    idx = jnp.arange(cols, dtype=jnp.int32)
    same_group = (idx[:, None] // cpg) == (idx[None, :] // cpg)   # exact int mask
    diag_sum = jnp.sum(jnp.trace(covar, axis1=-2, axis2=-1))
    covar_in = jnp.where(same_group, covar, jnp.float32(0.0))
    sq_sum = jnp.sum(covar_in * covar_in)

    denom = jnp.float32(num_channels)          # num_groups * channels_per_group
    mean_diag = diag_sum / denom
    sq_mean = sq_sum / denom
    return sq_mean / (mean_diag * mean_diag + jnp.float32(1e-20))


# ----------------------------------------------------------------------------
# Whiten module (forward semantics).
# ----------------------------------------------------------------------------
class Whiten:
    def __init__(self, num_groups, whitening_limit, prob, grad_scale):
        assert num_groups >= 1
        assert float(whitening_limit) >= 1
        assert float(grad_scale) >= 0
        self.num_groups = num_groups
        self.whitening_limit = float(whitening_limit)
        self.grad_scale = float(grad_scale)
        if isinstance(prob, float):
            prob = (prob, prob)
        self.min_prob, self.max_prob = prob
        assert 0 < self.min_prob <= self.max_prob <= 1
        self.prob = self.max_prob
        self.name = None

    def __call__(self, x):
        # Forward pass is identity; no Pallas copy (it would only add a
        # pointless HBM read+write).
        # TODO(synk): the backward-pass gradient modification
        # (WhiteningPenaltyFunction.backward: RNG-gated penalty, metric.grad,
        # grad-norm rescale) is host/autodiff logic with no forward-pass
        # Pallas equivalent; its hot path is exposed as whitening_metric().
        return x

    def metric(self, x):
        return whitening_metric(x, self.num_groups)


# ----------------------------------------------------------------------------
# Pure-JAX reference (validation only).
# ----------------------------------------------------------------------------
def _whitening_metric_ref(x, num_groups):
    x = x.reshape(-1, x.shape[-1]).astype(jnp.float32)
    num_frames, num_channels = x.shape
    cpg = num_channels // num_groups
    x = x.reshape(num_frames, num_groups, cpg).transpose(1, 0, 2)
    x = x - x.mean(axis=1, keepdims=True)
    covar = jnp.matmul(x.transpose(0, 2, 1), x)
    diag = jnp.diagonal(covar, axis1=1, axis2=2)
    mean_diag = diag.mean()
    sq_mean = (covar ** 2).sum() / (num_groups * cpg)
    return sq_mean / (mean_diag ** 2 + 1e-20)


if __name__ == "__main__":
    key = jax.random.PRNGKey(0)
    k1, k2, k3, k4 = jax.random.split(key, 4)

    # Tolerances are moderate: TPU f32 matmuls (both in the kernel's MXU dots
    # and in the XLA reference) default to reduced-precision passes, so the
    # two sides carry independent ~bf16-level rounding.  Structural bugs
    # (masking / centering / group masking) would be off by far more.
    RTOL_F32, ATOL_F32 = 5e-2, 5e-2

    # Case 1: cpg = 32/4 = 8 (not lane-aligned) -> groups batched to the full
    # 32-lane channel block; small frame tile forces multi-tile accumulation.
    x1 = jax.random.normal(k1, (2, 8, 32), dtype=jnp.float32) + 0.5
    m1 = jax.block_until_ready(whitening_metric(x1, num_groups=4,
                                                max_frame_tile=8))
    r1 = _whitening_metric_ref(x1, 4)
    assert bool(jnp.allclose(m1, r1, rtol=RTOL_F32, atol=ATOL_F32)), (m1, r1)

    # Case 2: cpg = 128 -> two groups batched into one 256-lane block; 24
    # frames with 16-frame tiles exercises the in-kernel tail mask (no pad).
    x2 = jax.random.normal(k2, (3, 8, 256), dtype=jnp.float32) + 0.25
    m2 = jax.block_until_ready(whitening_metric(x2, num_groups=2,
                                                max_frame_tile=16))
    r2 = _whitening_metric_ref(x2, 2)
    assert bool(jnp.allclose(m2, r2, rtol=RTOL_F32, atol=ATOL_F32)), (m2, r2)

    # Case 3: num_groups=1 with non-128-multiple channels (block = full dim).
    x3 = jax.random.normal(k3, (2, 8, 96), dtype=jnp.float32) - 0.3
    m3 = jax.block_until_ready(whitening_metric(x3, num_groups=1))
    r3 = _whitening_metric_ref(x3, 1)
    assert bool(jnp.allclose(m3, r3, rtol=RTOL_F32, atol=ATOL_F32)), (m3, r3)

    # Case 4: single group block with 4 frame tiles -> frame axis split into
    # two "parallel" slices (v7x 2-TC path); bf16 input stays bf16 into the
    # MXU (looser tolerance for bf16 product rounding).
    x4 = (jax.random.normal(k4, (8, 16, 64), dtype=jnp.float32) * 0.5
          ).astype(jnp.bfloat16)
    m4 = jax.block_until_ready(whitening_metric(x4, num_groups=1,
                                                max_frame_tile=32))
    r4 = _whitening_metric_ref(x4, 1)
    assert bool(jnp.allclose(m4, r4, rtol=1.5e-1, atol=1.5e-1)), (m4, r4)

    # Forward pass: identity (no kernel, no copy).
    whiten = Whiten(num_groups=4, whitening_limit=5.0, prob=(0.025, 0.25),
                    grad_scale=0.01)
    y = jax.block_until_ready(whiten(x1))
    assert y.shape == x1.shape and y.dtype == x1.dtype
    assert bool(jnp.allclose(y, x1))

    print("KERNEL_OK")
</pallas_src>

<mosaic_0001>
module attributes {stable_mosaic.version = 11 : i64} {
  func.func @kernel(%arg0: i32, %arg1: i32, %arg2: i32, %arg3: memref<8x32xf32, #tpu.memory_space<vmem>>, %arg4: memref<1x32x32xf32, #tpu.memory_space<vmem>>, %arg5: memref<1x1x32xf32, #tpu.memory_space<vmem>>) attributes {dimension_semantics = [#tpu.dimension_semantics<parallel>, #tpu.dimension_semantics<parallel>, #tpu.dimension_semantics<arbitrary>], iteration_bounds = array<i64: 1, 1, 2>, scalar_prefetch = 0 : i64, scratch_operands = 0 : i64, tpu.core_type = #tpu.core_type<tc>, window_params = [{transform_indices = @transform_0, window_bounds = array<i64: 8, 32>}, {transform_indices = @transform_1, window_bounds = array<i64: 1, 32, 32>}, {transform_indices = @transform_2, window_bounds = array<i64: 1, 1, 32>}]} {
    %c0_i32 = arith.constant 0 : i32
    %0 = arith.cmpi eq, %arg2, %c0_i32 : i32
    %1 = arith.extui %0 : i1 to i32
    %c0_i32_0 = arith.constant 0 : i32
    %2 = arith.cmpi ne, %1, %c0_i32_0 : i32
    scf.if %2 {
      %cst_16 = arith.constant 0.000000e+00 : f32
      %15 = vector.broadcast %cst_16 : f32 to vector<1x32x32xf32>
      %c0_17 = arith.constant 0 : index
      %c0_18 = arith.constant 0 : index
      %c0_19 = arith.constant 0 : index
      %16 = vector.load %arg4[%c0_17, %c0_18, %c0_19] : memref<1x32x32xf32, #tpu.memory_space<vmem>>, vector<1x32x32xf32>
      tpu.vector_store %arg4[%c0_17, %c0_18, %c0_19], %15 {strides = array<i32>} : memref<1x32x32xf32, #tpu.memory_space<vmem>>, vector<1x32x32xf32>,
      %cst_20 = arith.constant 0.000000e+00 : f32
      %17 = vector.broadcast %cst_20 : f32 to vector<1x1x32xf32>
      %c0_21 = arith.constant 0 : index
      %c0_22 = arith.constant 0 : index
      %c0_23 = arith.constant 0 : index
      %18 = vector.load %arg5[%c0_21, %c0_22, %c0_23] : memref<1x1x32xf32, #tpu.memory_space<vmem>>, vector<1x1x32xf32>
      tpu.vector_store %arg5[%c0_21, %c0_22, %c0_23], %17 {strides = array<i32>} : memref<1x1x32xf32, #tpu.memory_space<vmem>>, vector<1x1x32xf32>,
    } else {
    }
    %c0 = arith.constant 0 : index
    %c0_1 = arith.constant 0 : index
    %3 = vector.load %arg3[%c0, %c0_1] : memref<8x32xf32, #tpu.memory_space<vmem>>, vector<8x32xf32>
    %c0_2 = arith.constant 0 : index
    %c0_3 = arith.constant 0 : index
    %c0_4 = arith.constant 0 : index
    %4 = vector.load %arg4[%c0_2, %c0_3, %c0_4] : memref<1x32x32xf32, #tpu.memory_space<vmem>>, vector<1x32x32xf32>
    %cst = arith.constant dense<0.000000e+00> : vector<32x32xf32>
    %5 = tpu.matmul %3, %3, %cst {dimension_numbers = #tpu.dot_dimension_numbers<[0], [0], [1], [1], [0, 1, 1, 1], [], []>} : vector<8x32xf32>, vector<8x32xf32>, vector<32x32xf32> -> vector<32x32xf32>
    %6 = vector.shape_cast %5 : vector<32x32xf32> to vector<1x32x32xf32>
    %7 = arith.addf %4, %6 : vector<1x32x32xf32>
    %c0_5 = arith.constant 0 : index
    %c0_6 = arith.constant 0 : index
    %c0_7 = arith.constant 0 : index
    %8 = vector.load %arg4[%c0_5, %c0_6, %c0_7] : memref<1x32x32xf32, #tpu.memory_space<vmem>>, vector<1x32x32xf32>
    tpu.vector_store %arg4[%c0_5, %c0_6, %c0_7], %7 {strides = array<i32>} : memref<1x32x32xf32, #tpu.memory_space<vmem>>, vector<1x32x32xf32>,
    %cst_8 = arith.constant 1.000000e+00 : f32
    %9 = vector.broadcast %cst_8 : f32 to vector<1x8xf32>
    %c0_9 = arith.constant 0 : index
    %c0_10 = arith.constant 0 : index
    %c0_11 = arith.constant 0 : index
    %10 = vector.load %arg5[%c0_9, %c0_10, %c0_11] : memref<1x1x32xf32, #tpu.memory_space<vmem>>, vector<1x1x32xf32>
    %cst_12 = arith.constant dense<0.000000e+00> : vector<1x32xf32>
    %11 = tpu.matmul %9, %3, %cst_12 {dimension_numbers = #tpu.dot_dimension_numbers<[1], [0], [0], [1], [0, 0, 1, 1], [], []>} : vector<1x8xf32>, vector<8x32xf32>, vector<1x32xf32> -> vector<1x32xf32>
    %12 = vector.shape_cast %11 : vector<1x32xf32> to vector<1x1x32xf32>
    %13 = arith.addf %10, %12 : vector<1x1x32xf32>
    %c0_13 = arith.constant 0 : index
    %c0_14 = arith.constant 0 : index
    %c0_15 = arith.constant 0 : index
    %14 = vector.load %arg5[%c0_13, %c0_14, %c0_15] : memref<1x1x32xf32, #tpu.memory_space<vmem>>, vector<1x1x32xf32>
    tpu.vector_store %arg5[%c0_13, %c0_14, %c0_15], %13 {strides = array<i32>} : memref<1x1x32xf32, #tpu.memory_space<vmem>>, vector<1x1x32xf32>,
    return
  }
  func.func @transform_0(%arg0: i32, %arg1: i32, %arg2: i32) -> (i32, i32) {
    %c2_i32 = arith.constant 2 : i32
    %0 = arith.muli %arg1, %c2_i32 : i32
    %1 = arith.addi %0, %arg2 : i32
    %c0_i32 = arith.constant 0 : i32
    return %1, %arg0 : i32, i32
  }
  func.func @transform_1(%arg0: i32, %arg1: i32, %arg2: i32) -> (i32, i32, i32) {
    %c1_i32 = arith.constant 1 : i32
    %0 = arith.muli %arg0, %c1_i32 : i32
    %1 = arith.addi %0, %arg1 : i32
    %c0_i32 = arith.constant 0 : i32
    %c0_i32_0 = arith.constant 0 : i32
    %c0_i32_1 = arith.constant 0 : i32
    return %1, %c0_i32, %c0_i32_0 : i32, i32, i32
  }
  func.func @transform_2(%arg0: i32, %arg1: i32, %arg2: i32) -> (i32, i32, i32) {
    %c1_i32 = arith.constant 1 : i32
    %0 = arith.muli %arg0, %c1_i32 : i32
    %1 = arith.addi %0, %arg1 : i32
    %c0_i32 = arith.constant 0 : i32
    %c0_i32_0 = arith.constant 0 : i32
    %c0_i32_1 = arith.constant 0 : i32
    return %1, %c0_i32, %c0_i32_0 : i32, i32, i32
  }
}

</mosaic_0001>

<bundles_post_ra>
// kernel: tpu_custom_call.1
= control target key start
LH: loop header
LB: loop body
LE: loop exit
PB: predicated region body
PF: predicated region fallthrough
CT: control target
= control target key end

     0   :  { %8 = vsyncpa [#allocation3], 0  ;;  %s990_s0 = inlined_call_operand.hbm [shape: f32[16,32], index: 0, kind: input, shape index: {}]   ;;  %s991_s1 = inlined_call_operand.hbm [shape: f32[1,32,32], index: 1, kind: output, shape index: {0}]   ;;  %s992_s2 = inlined_call_operand.hbm [shape: f32[1,1,32], index: 2, kind: output, shape index: {1}]  }
   0x1   :  { %10 = vsyncpa [#allocation3 + $0x1], 0 }
   0x2   :  { %11 = vsyncpa [#allocation4], 0 }
   0x3   :  { %12 = vsyncpa [#allocation7], 0  ;;  %s813_s9 = smov 0   ;;  %s815_s10 = smov 0  }
   0x4   :  { %s817_s11 = smov 0   ;;  %s819_s12 = smov 0  }
   0x5   :  { %s821_s13 = smov 0   ;;  %s823_s14 = smov 0  }
   0x6 LB: > { %s533_s15 = sadd.s32 4294967295, %s787_s14   ;;  %s30_s16 = sadd.s32 1, %s783_s13  ;;  %s787_s14 = sphi %s823_s14, %s18_s14   ;;  %s783_s13 = sphi %s821_s13, %s1003_s13   ;;  %s779_s12 = sphi %s819_s12, %s1002_s12   ;;  %s775_s11 = sphi %s817_s11, %s1001_s11   ;;  %s771_s10 = sphi %s815_s10, %s1000_s10   ;;  %s767_s9 = sphi %s813_s9, %s999_s9  }
   0x7   : > { %p31_p0 = scmp.ge.s32.totalorder %s30_s16, 2  ;;  %s50_s17 = sadd.s32 1, %s775_s11 }
   0x8   : > { %p57_p1 = scmp.ne.s32.totalorder %s775_s11, %s771_s10  ;;  %p58_p2 = scmp.eq.s32.totalorder %s787_s14, 0 }
   0x9   : > { %s1005_s16 = smov (%p31_p0, %s30_s16), 0  ;;  %p63_p4 = scmp.ne.s32.totalorder %s771_s10, %s767_s9 }
   0xa   : > { %p849_p3 = por %p58_p2, %p57_p1  ;;  %s45_s19 = ssub.s32 %s783_s13, %s1005_s16 }
   0xb   : > { %p64_p5 = scmp.eq.s32.totalorder %s533_s15, 0  ;;  %p48_p6 = scmp.eq.s32.totalorder %s45_s19, 0 }
   0xc   : > { %p586_p8 = scmp.lt.s32.totalorder %s787_s14, 2  ;;  %s143_s22 = sand.u32 1, %s775_s11  }
   0xd   : > { %p858_p7 = por %p64_p5, %p63_p4  ;;  %s537_s23 = sshll.u32 %s783_s13, 7 }
   0xe   : > { %s864_s21 = scalar_select %p48_p6, %s775_s11, %s50_s17  }
   0xf   : > { %s536_s24 = sshll.u32 %s143_s22, 3  ;;  %s871_s27 = scalar_lea.hbm %s990_s0, %s537_s23 }
  0x10   : > { %s147_s28 = scalar_lea.vmem [#allocation2], %s536_s24  ;;  %p875_p9 = pnand %p586_p8, %p849_p3 }
  0x11   : > { %s157_s29 = sshll.u32 %s147_s28, 4  ;;  %s144_s3 = scalar_lea.sflag [#allocation3], %s143_s22  ;;  %s879_s29 = int_to_ptr.vmem [resolvable:$true] %s157_s29 }
  0x12   : > { %s647_s4 = scalar_lea.hbm %s871_s27, 128  ;;  %p649_p13 = pneg %p875_p9 }
  0x13   : > { %p648_p12 = scmp.ne.s32.totalorder %s871_s27, %s647_s4  ;;  %s652_s7 = scalar_lea.hbm %s990_s0, 256 }
  0x14   : > { %p653_p2 = scmp.lt.u32.totalorder %s871_s27, %s990_s0  ;;  %p654_p3 = scmp.lt.u32.totalorder %s652_s7, %s647_s4 }
  0x15   : > { %p650_p0 = pnand %p649_p13, %p648_p12  ;;  %p656_p5 = scmp.lt.u32.totalorder %s647_s4, %s871_s27 }
  0x16   : > { %p655_p4 = por %p654_p3, %p653_p2 }
  0x17   : > { %p651_p1 = pneg %p650_p0 }
  0x18   : > { %p657_p6 = por %p656_p5, %p655_p4 }
  0x1a   : > { %p658_p8 = pnand %p657_p6, %p651_p1 }
  0x1c   : > { %661 = shalt.err (!%p658_p8)
}
  0x1d   : > { %s662_s17 = scalar_lea.vmem %s879_s29, 128  ;;  %s789_s18 = smov [#allocation2]  }
  0x1e   : > { %p663_p12 = scmp.ne.s32.totalorder %s879_s29, %s662_s17  ;;  %s667_s19 = sshll.u32 %s789_s18, 4  ;;  %s668_s19 = int_to_ptr.vmem [resolvable:$false] %s667_s19 }
  0x1f   : > { %s669_s22 = scalar_lea.vmem %s668_s19, 256  ;;  %p670_p11 = scmp.lt.s32.totalorder %s879_s29, %s668_s19 }
  0x20   : > { %p665_p0 = pnand %p663_p12, %p649_p13  ;;  %p671_p2 = scmp.lt.s32.totalorder %s669_s22, %s662_s17 }
  0x22   : > { %p666_p10 = pneg %p665_p0  ;;  %p672_p3 = por %p671_p2, %p670_p11 }
  0x24   : > { %p673_p4 = pnand %p672_p3, %p666_p10 }
  0x26   : > { %676 = shalt.err (!%p673_p4)
}
  0x27   : > { %585 = dma.hbm_to_vmem [thread:$0]  (!%p875_p9), %s871_s27, 128, %s879_s29, %s144_s3  }
  0x28   : > { %p996_p1 = scmp.lt.s32.totalorder %s787_s14, 3  ;;  %p997_p5 = scmp.ge.s32.totalorder %s787_s14, 1 }
  0x2a   : > { %p163_p13 = pnand %p997_p5, %p996_p1 }
  0x2b   : > { %s168_s23 = sand.u32 (!%p163_p13), 1, %s771_s10  }
  0x2c   : > { %166 = sbr.rel (%p163_p13) target bundleno = 436 (0x1b4), region = 24  ;;  %s539_s24 = sshll.u32 (!%p163_p13), %s168_s23, 3 }
  0x2d   : > { %s169_s25 = scalar_lea.sflag (!%p163_p13), [#allocation3], %s168_s23  ;;  %s172_s26 = scalar_lea.vmem (!%p163_p13), [#allocation2], %s539_s24 }
  0x33   : > { %754 = dma.done.wait (%p858_p7), %s169_s25, 128  }
  0x34   : > { %756 = vsyncadd (%p858_p7), %s169_s25, 4294967168  ;;  %p540_p10 = scmp.ne.s32.totalorder %s779_s12, 0 }
  0x35   : > { %vm196_vm0 = vcmask (!%p540_p10), 261120   ;;  %vm201_vm1 = vcmask (!%p540_p10), 253952   ;;  %v790_v0 = vmov (!%p540_p10), 0.0  }
  0x36   : > { %195 = sbr.rel (%p540_p10) target bundleno = 61 (0x3d), region = 32  ;;  %197 = vst.msk [vmem:[#allocation5] sm:$0xff] (!%p540_p10), %vm196_vm0, %v790_v0  ;;  %198 = vst.msk [vmem:[#allocation5 + $0x8] sm:$0xff] (!%p540_p10), %vm196_vm0, %v790_v0 }
  0x37   : > { %199 = vst.msk [vmem:[#allocation5 + $0x10] sm:$0xff] (!%p540_p10), %vm196_vm0, %v790_v0  ;;  %200 = vst.msk [vmem:[#allocation5 + $0x18] sm:$0xff] (!%p540_p10), %vm196_vm0, %v790_v0 }
  0x38   : > { %202 = vst.msk [vmem:[#allocation6] sm:$0x1] (!%p540_p10), %vm201_vm1, %v790_v0 }
  0x3d PF: > { %v203_v1 = vld [vmem:[%s172_s26] sm:$0xff]  ;;  %v791_v2 = vmov 0.0   ;;  %vm792_vm2 = vmmov 0   ;;  %vm240_vm3 = vcmask 64512   ;;  %v793_v3 = vmov 1.0   ;;  %p920_p7 = scmp.eq.s32.totalorder %s533_s15, 1 }
  0x3e   : > { %208 = vxpose.xlu0.b32.start.end [1/1] (short) (narrow) %v203_v1, 32  ;;  %559 = vmatprep.subr.mxu0 %v203_v1  ;;  %vm422_vm4 = vcmask 253952   ;;  %s794_s20 = smov [#allocation6]  }
  0x3f   : > { %560 = vmatpush3.msra.mxu0 %v203_v1  ;;  %567 = vmatprep.subr.mxu1 %v791_v2  ;;  %v347_v9 = vld [vmem:[#allocation6] sm:$0x1]  ;;  %s451_s27 = sshll.u32 %s794_s20, 4  ;;  %s452_s27 = int_to_ptr.vmem [resolvable:$true] %s451_s27 }
  0x40   : > { %569 = vmatprep.mubr.msk.f32.mxu1 %vm792_vm2, %v791_v2  ;;  %568 = vmatpush3.msra.mxu1 %v203_v1  ;;  %s677_s28 = scalar_lea.vmem %s452_s27, 16  ;;  %s683_s29 = scalar_lea.vmem %s452_s27, 32 }
  0x41   : > { %570 = vmatmul.mubr.msk.f32.vlgmr.msra.gmra.mrb[0].mxu1 %vm240_vm3, %v793_v3  ;;  %p678_p9 = scmp.ne.s32.totalorder %s452_s27, %s677_s28  ;;  %p684_p8 = scmp.lt.s32.totalorder %s452_s27, %s452_s27 }
  0x42   : > { %p685_p12 = scmp.lt.s32.totalorder %s683_s29, %s677_s28 }
  0x43   : > { %p679_p11 = pnand %p678_p9, %p920_p7 }
  0x44   : > { %p686_p0 = por %p685_p12, %p684_p8 }
  0x45   : > { %p680_p6 = pneg %p679_p11 }
  0x47   : > { %p687_p2 = pnand %p686_p0, %p680_p6 }
  0xbe   : > { %v224_v4 = vpop.trf.xlu0 }
  0xbf   : > { %561 = vmatprep.mubr.msk.f32.mxu0 %vm240_vm3, %v224_v4 }
  0xc2   : > { %v225_v5 = vpop.trf.xlu0 }
  0xc3   : > { %562 = vmatmul.mubr.msk.f32.vlgmr.msra.gmra.mrb[0].mxu0 %vm240_vm3, %v225_v5 }
  0xc6   : > { %v226_v6 = vpop.trf.xlu0 }
  0xc7   : > { %564 = vmatprep.mubr.msk.f32.mxu0 %vm240_vm3, %v226_v6 }
  0xca   : > { %v227_v7 = vpop.trf.xlu0 }
  0xcb   : > { %565 = vmatmul.mubr.msk.f32.gmra.mrb[2].mxu0 %vm240_vm3, %v227_v7 }
 0x114   : > { %v417_v8 = vpop.f32.mrb[0].mxu1 }
 0x115   : > { %v571_v10 = vpop.f32.mrb[1].mxu1  ;;  %v421_v11 = vadd.f32 %v417_v8, %v347_v9 }
 0x117   : > { %423 = vst.msk [vmem:[#allocation6] sm:$0x1] %vm422_vm4, %v421_v11 }
 0x118   : > { %690 = shalt.err (!%p687_p2)
}
 0x119   : > { %s691_s3 = scalar_lea.hbm %s992_s2, 16 }
 0x11a   : > { %p692_p3 = scmp.ne.s32.totalorder %s992_s2, %s691_s3  ;;  %p697_p5 = scmp.lt.u32.totalorder %s691_s3, %s992_s2 }
 0x11c   : > { %p693_p4 = pnand %p692_p3, %p920_p7 }
 0x11e   : > { %p694_p1 = pneg %p693_p4 }
 0x120   : > { %p699_p13 = pnand %p697_p5, %p694_p1 }
 0x122   : > { %702 = shalt.err (!%p699_p13)
}
 0x123   : > { %577 = dma.vmem_to_hbm [thread:$0]  (%p920_p7), %s452_s27, 16, %s992_s2, [#allocation7]   ;;  %v205_v12 = vld [vmem:[#allocation5 + $0x8] sm:$0xff]  ;;  %v204_v13 = vld [vmem:[#allocation5] sm:$0xff]  ;;  %vm342_vm5 = vcmask 261120   ;;  %v207_v18 = vld [vmem:[#allocation5 + $0x18] sm:$0xff] }
 0x124   : > { %s795_s17 = smov [#allocation5]   ;;  %v206_v19 = vld [vmem:[#allocation5 + $0x10] sm:$0xff] }
 0x125   : > { %s434_s18 = sshll.u32 %s795_s17, 4  ;;  %s435_s18 = int_to_ptr.vmem [resolvable:$true] %s434_s18 }
 0x126   : > { %s703_s19 = scalar_lea.vmem %s435_s18, 512  ;;  %p710_p6 = scmp.lt.s32.totalorder %s435_s18, %s435_s18 }
 0x127   : > { %p704_p10 = scmp.ne.s32.totalorder %s435_s18, %s703_s19  ;;  %p711_p8 = scmp.lt.s32.totalorder %s703_s19, %s703_s19 }
 0x129   : > { %p705_p9 = pnand %p704_p10, %p920_p7  ;;  %p712_p12 = por %p711_p8, %p710_p6 }
 0x12b   : > { %p706_p11 = pneg %p705_p9 }
 0x12d   : > { %p713_p0 = pnand %p712_p12, %p706_p11 }
 0x196   : > { %v563_v14 = vpop.f32.mrb[0].mxu0 }
 0x197   : > { %v339_v15 = vadd.f32 %v563_v14, %v205_v12  ;;  %v319_v16 = vpop.f32.mrb[1].mxu0 }
 0x198   : > { %v338_v17 = vadd.f32 %v319_v16, %v204_v13 }
 0x199   : > { %344 = vst.msk [vmem:[#allocation5 + $0x8] sm:$0xff] %vm342_vm5, %v339_v15 }
 0x19a   : > { %343 = vst.msk [vmem:[#allocation5] sm:$0xff] %vm342_vm5, %v338_v17 }
 0x19e   : > { %v566_v20 = vpop.f32.mrb[2].mxu0 }
 0x19f   : > { %v341_v21 = vadd.f32 %v566_v20, %v207_v18  ;;  %v329_v22 = vpop.f32.mrb[3].mxu0 }
 0x1a0   : > { %v340_v23 = vadd.f32 %v329_v22, %v206_v19 }
 0x1a1   : > { %346 = vst.msk [vmem:[#allocation5 + $0x18] sm:$0xff] %vm342_vm5, %v341_v21 }
 0x1a2   : > { %345 = vst.msk [vmem:[#allocation5 + $0x10] sm:$0xff] %vm342_vm5, %v340_v23 }
 0x1a3   : > { %716 = shalt.err (!%p713_p0)
}
 0x1a4   : > { %s717_s24 = scalar_lea.hbm %s991_s1, 512 }
 0x1a5   : > { %p718_p2 = scmp.ne.s32.totalorder %s991_s1, %s717_s24  ;;  %p723_p1 = scmp.lt.u32.totalorder %s717_s24, %s991_s1 }
 0x1a7   : > { %p719_p3 = pnand %p718_p2, %p920_p7 }
 0x1a9   : > { %p720_p4 = pneg %p719_p3 }
 0x1ab   : > { %p725_p5 = pnand %p723_p1, %p720_p4 }
 0x1ad   : > { %728 = shalt.err (!%p725_p5)
}
 0x1ae   : > { %s796_s28 = smov 128   ;;  %s797_s29 = smov 8  }
 0x1af   : > { %575 = dma.vmem_to_hbm [thread:$0]  (%p920_p7), %s435_s18, 512, %s991_s1, [#allocation4], %s796_s28, %s796_s28, %s797_s29  }
 0x1b0   : > { %758 = dma.done.wait (%p920_p7), [#allocation4], 512  }
 0x1b1   : > { %760 = vsyncadd (%p920_p7), [#allocation4], 4294966784 }
 0x1b2   : > { %762 = dma.done.wait (%p920_p7), [#allocation7], 16  }
 0x1b3   : > { %764 = vsyncadd (%p920_p7), [#allocation7], 4294967280 }
 0x1b4 PF: > { %s18_s14 = sadd.s32 1, %s787_s14   ;;  %s999_s9 = smov %s771_s10 }
 0x1b5   : > { %p15_p13 = scmp.ge.s32.totalorder %s18_s14, 4   ;;  %s1000_s10 = smov %s775_s11 }
 0x1b6   : > { %s1001_s11 = smov %s864_s21  ;;  %s1002_s12 = smov %s783_s13 }
 0x1b7   : > { %s1003_s13 = smov %s1005_s16  ;;  %17 = sbr.rel (!%p15_p13) target bundleno = 6 (0x6), region = 75 }
 0x1be   :  { %468 = vsyncpa [#allocation3], 1 }
 0x1bf   :  { %470 = vsyncpa [#allocation3 + $0x1], 1 }
 0x1c0   :  { %471 = vsyncpa [#allocation4], 1 }
 0x1c1   :  { %473 = vsyncpa [#allocation4 + $0x1], 1 }
 0x1c2   :  { %474 = vsyncpa [#allocation7], 1 }

</bundles_post_ra>
